<compile_context>
chip_gen: v7x
topology: tpu7x:2x2x1
jax: 0.10.0
libtpu: 0.0.40
codegen_flags: <defaults>
</compile_context>

<pallas_src>
import jax
import jax.numpy as jnp
from jax.experimental import pallas as pl
from jax.experimental.pallas import tpu as pltpu


def _round_up(x: int, m: int) -> int:
    return (x + m - 1) // m * m


def _sublane_multiple(compute_dtype) -> int:
    itemsize = jnp.dtype(compute_dtype).itemsize
    return {1: 32, 2: 16, 4: 8}.get(itemsize, 8)


def _vmem_cap_bytes() -> int:
    """Per-generation VMEM budget: physical capacity with ~13/16 headroom
    (~52 MiB on v7x's 64 MiB/TC, ~104 MiB on v5e/v6e's 128 MiB)."""
    try:
        phys = int(pltpu.get_tpu_info().vmem_capacity_bytes)
    except Exception:
        phys = 64 << 20  # conservative fallback (v7x per-TC VMEM)
    return (phys * 13) // 16


def mlp_kernel(x_ref, w1_ref, b1_ref, w2_ref, b2_ref, w3_ref, b3_ref, o_ref):
    """x @ W1 + b1 -> ReLU -> @ W2 + b2 -> ReLU -> @ W3 + b3.
    Weights are pre-transposed to (in, out); accumulation is f32; the bias+ReLU
    epilogue runs in f32 and is cast to the compute dtype immediately."""
    cdt = w2_ref.dtype
    h = jnp.dot(x_ref[...], w1_ref[...], preferred_element_type=jnp.float32)
    h = jnp.maximum(h + b1_ref[...], 0.0).astype(cdt)
    h = jnp.dot(h, w2_ref[...], preferred_element_type=jnp.float32)
    h = jnp.maximum(h + b2_ref[...], 0.0).astype(cdt)
    h = jnp.dot(h, w3_ref[...], preferred_element_type=jnp.float32)
    o_ref[...] = (h + b3_ref[...]).astype(o_ref.dtype)


def prepare_params(params, compute_dtype=jnp.bfloat16):
    """One-time prep (hoisted out of the forward pass):
    transpose PyTorch (out_f, in_f) weights -> (in_f, out_f), cast to the MXU
    compute dtype; biases stay f32 (f32 epilogue). Small problems keep their
    exact shapes (fast path / no padded MACs); larger layers are zero-padded
    to 256-wide K/N tiles (full-width MXU on v6e/v7x), or 128 for tiny dims."""
    d_in = int(params["w1"].shape[1])
    h1 = int(params["w1"].shape[0])
    h2 = int(params["w2"].shape[0])
    n_out = int(params["w3"].shape[0])
    itemsize = jnp.dtype(compute_dtype).itemsize
    w_bytes = (d_in * h1 + h1 * h2 + h2 * n_out) * itemsize
    small = max(d_in, h1, h2, n_out) <= 512 and w_bytes <= (2 << 20)

    def pad_dim(d):
        if small:
            return d
        return _round_up(d, 256) if d >= 192 else _round_up(d, 128)

    def prep_w(w):
        wt = jnp.asarray(w, jnp.float32).T  # (in, out)
        din, dout = wt.shape
        wt = jnp.pad(wt, ((0, pad_dim(din) - din), (0, pad_dim(dout) - dout)))
        return wt.astype(compute_dtype)

    def prep_b(b):
        b = jnp.asarray(b, jnp.float32).reshape(1, -1)
        f = b.shape[1]
        return jnp.pad(b, ((0, 0), (0, pad_dim(f) - f)))

    return {
        "w1": prep_w(params["w1"]), "b1": prep_b(params["b1"]),
        "w2": prep_w(params["w2"]), "b2": prep_b(params["b2"]),
        "w3": prep_w(params["w3"]), "b3": prep_b(params["b3"]),
        "d_in": d_in, "n_out": n_out, "small": small,
    }


def mlp_forward(x, prepped, *, max_batch_tile=512, fast_path_max_batch=256):
    """x: (B, ...) -> flattened to (B, D). prepped: output of prepare_params."""
    w1, b1 = prepped["w1"], prepped["b1"]
    w2, b2 = prepped["w2"], prepped["b2"]
    w3, b3 = prepped["w3"], prepped["b3"]
    d_in, n_out = prepped["d_in"], prepped["n_out"]
    compute_dtype = w1.dtype

    B = x.shape[0]
    x2d = x.reshape(B, -1)  # nn.Flatten()
    assert x2d.shape[1] == d_in

    # ---------------- Fast path: tiny problem, no grid, no padding ----------
    if prepped["small"] and B <= fast_path_max_batch:
        out = pl.pallas_call(
            mlp_kernel,
            out_shape=jax.ShapeDtypeStruct((B, n_out), jnp.float32),
        )(x2d.astype(compute_dtype), w1, b1, w2, b2, w3, b3)
        return out

    # ---------------- Tiled path: batch-tiled, weights VMEM-resident --------
    Dp, Hp = w1.shape
    H2p = w2.shape[1]
    Op = w3.shape[1]
    itemsize = jnp.dtype(compute_dtype).itemsize
    sub = _sublane_multiple(compute_dtype)
    cap = _vmem_cap_bytes()

    def vmem_est(tb, wbuf):
        e = 2 * tb * Dp * itemsize          # x tile, double-buffered
        e += 2 * tb * Op * 4                # out tile (f32), double-buffered
        e += wbuf * ((Dp * Hp + Hp * H2p + H2p * Op) * itemsize
                     + (Hp + H2p + Op) * 4)  # resident weights + biases
        e += tb * (Hp + H2p) * 4            # transient f32 epilogue values
        return int(1.5 * e)                 # headroom for compiler scratch

    if vmem_est(sub, 1) > cap:
        # TODO(synk): add a K/N grid axis (or pltpu.emit_pipeline over the
        # hidden dim) with an f32 accumulator once weights no longer fit
        # VMEM-resident (e.g. 3 x 4096^2 bf16 ~ 96 MiB on v7x).
        raise NotImplementedError(
            "MLP weights too large to stay VMEM-resident; K/N tiling not implemented")

    # Pick tile count first, then TB, so batch padding is bounded by one tile.
    n_tiles = pl.cdiv(B, max_batch_tile)
    if B >= 2 * sub:
        n_tiles = max(n_tiles, 2)  # v7x: give both TensorCores a tile
    TB = _round_up(pl.cdiv(B, n_tiles), sub)
    while TB > sub and vmem_est(TB, 1) > cap:
        TB = max(sub, _round_up(TB // 2, sub))  # shrink TB, don't clip the limit
    n_tiles = pl.cdiv(B, TB)
    Bp = n_tiles * TB

    # Only pad the ragged edges; skip the pad op entirely when aligned.
    xc = x2d.astype(compute_dtype)
    if Bp != B or Dp != d_in:
        xc = jnp.pad(xc, ((0, Bp - B), (0, Dp - d_in)))

    def run(single_buffer_weights):
        wbuf = 1 if single_buffer_weights else 2
        wmode = {"pipeline_mode": pl.Buffered(1)} if single_buffer_weights else {}
        vmem_limit = int(min(max(vmem_est(TB, wbuf), 16 << 20), cap))
        call = pl.pallas_call(
            mlp_kernel,
            out_shape=jax.ShapeDtypeStruct((Bp, Op), jnp.float32),
            grid_spec=pltpu.PrefetchScalarGridSpec(
                num_scalar_prefetch=0,
                grid=(n_tiles,),
                in_specs=[
                    pl.BlockSpec((TB, Dp), lambda i: (i, 0)),          # x: batch-tiled
                    pl.BlockSpec((Dp, Hp), lambda i: (0, 0), **wmode),  # weights/biases:
                    pl.BlockSpec((1, Hp), lambda i: (0, 0), **wmode),   #  constant index_map
                    pl.BlockSpec((Hp, H2p), lambda i: (0, 0), **wmode), #  -> VMEM-resident,
                    pl.BlockSpec((1, H2p), lambda i: (0, 0), **wmode),  #  single-buffered
                    pl.BlockSpec((H2p, Op), lambda i: (0, 0), **wmode),
                    pl.BlockSpec((1, Op), lambda i: (0, 0), **wmode),
                ],
                out_specs=pl.BlockSpec((TB, Op), lambda i: (i, 0)),
            ),
            compiler_params=pltpu.CompilerParams(
                dimension_semantics=("parallel",),  # independent batch tiles (v7x: 2 TCs)
                vmem_limit_bytes=vmem_limit,
            ),
        )
        return call(xc, w1, b1, w2, b2, w3, b3)

    try:
        out_pad = jax.block_until_ready(run(True))
    except Exception:
        # This jax build rejected pipeline_mode=pl.Buffered(1); fall back to the
        # default double-buffered weight specs (correct, just more VMEM).
        out_pad = run(False)

    return out_pad[:B, :n_out]


def init_params(key, input_size, linear_nodes, n_output_vars):
    """Deterministic init mimicking nn.Linear's U(-1/sqrt(fan_in), 1/sqrt(fan_in))."""
    ks = jax.random.split(key, 6)

    def lin(kw, kb, fan_in, fan_out):
        bound = 1.0 / jnp.sqrt(jnp.float32(fan_in))
        w = jax.random.uniform(kw, (fan_out, fan_in), jnp.float32, -bound, bound)
        b = jax.random.uniform(kb, (fan_out,), jnp.float32, -bound, bound)
        return w, b

    w1, b1 = lin(ks[0], ks[1], input_size, linear_nodes)
    w2, b2 = lin(ks[2], ks[3], linear_nodes, linear_nodes)
    w3, b3 = lin(ks[4], ks[5], linear_nodes, n_output_vars)
    return {"w1": w1, "b1": b1, "w2": w2, "b2": b2, "w3": w3, "b3": b3}


def _reference(x, params):
    x2d = x.reshape(x.shape[0], -1)
    h1 = jnp.maximum(x2d @ params["w1"].T + params["b1"], 0.0)
    h2 = jnp.maximum(h1 @ params["w2"].T + params["b2"], 0.0)
    return h2 @ params["w3"].T + params["b3"]


if __name__ == "__main__":
    key = jax.random.PRNGKey(0)
    k_x, k_p, k_x2, k_p2 = jax.random.split(key, 4)

    # ---- Primary (shipped) tiny case: batch=2, (4, 8) -> flatten -> 32 feats,
    #      linear_nodes=32 hidden, n_output_vars=8.  Exercises the fast path.
    B, C, L = 2, 4, 8
    input_size, linear_nodes, n_output_vars = C * L, 32, 8

    x = jax.random.normal(k_x, (B, C, L), dtype=jnp.float32)
    params = init_params(k_p, input_size, linear_nodes, n_output_vars)
    ref = _reference(x, params)

    # f32 compute path: semantic check.
    pp_f32 = prepare_params(params, compute_dtype=jnp.float32)
    out_f32 = jax.block_until_ready(mlp_forward(x, pp_f32))
    assert out_f32.shape == (B, n_output_vars)
    assert jnp.allclose(out_f32, ref, atol=1e-5, rtol=1e-5)

    # bf16-MXU / f32-accumulate path (default): within bf16 rounding error.
    pp_bf16 = prepare_params(params)  # bf16 default
    out_bf16 = jax.block_until_ready(mlp_forward(x, pp_bf16))
    assert out_bf16.shape == (B, n_output_vars)
    assert jnp.allclose(out_bf16, ref, atol=5e-2, rtol=5e-2)

    # ---- Medium case: exercises the tiled path (grid of >=2 batch tiles,
    #      batch padding, VMEM-resident single-buffered weights).
    Bm, d_in_m, hid_m, out_m = 300, 512, 256, 128
    xm = jax.random.normal(k_x2, (Bm, d_in_m), dtype=jnp.float32)
    params_m = init_params(k_p2, d_in_m, hid_m, out_m)
    ref_m = _reference(xm, params_m)

    ppm_f32 = prepare_params(params_m, compute_dtype=jnp.float32)
    out_m_f32 = jax.block_until_ready(mlp_forward(xm, ppm_f32))
    assert out_m_f32.shape == (Bm, out_m)
    assert jnp.allclose(out_m_f32, ref_m, atol=1e-2, rtol=1e-2)

    ppm_bf16 = prepare_params(params_m)
    out_m_bf16 = jax.block_until_ready(mlp_forward(xm, ppm_bf16))
    assert out_m_bf16.shape == (Bm, out_m)
    assert jnp.allclose(out_m_bf16, ref_m, atol=1e-1, rtol=1e-1)

    print("KERNEL_OK")
</pallas_src>

<mosaic_0001>
module attributes {stable_mosaic.version = 11 : i64} {
  func.func @mlp_kernel(%arg0: memref<2x32xf32, #tpu.memory_space<vmem>>, %arg1: memref<32x32xf32, #tpu.memory_space<vmem>>, %arg2: memref<1x32xf32, #tpu.memory_space<vmem>>, %arg3: memref<32x32xf32, #tpu.memory_space<vmem>>, %arg4: memref<1x32xf32, #tpu.memory_space<vmem>>, %arg5: memref<32x8xf32, #tpu.memory_space<vmem>>, %arg6: memref<1x8xf32, #tpu.memory_space<vmem>>, %arg7: memref<2x8xf32, #tpu.memory_space<vmem>>) attributes {dimension_semantics = [], scalar_prefetch = 0 : i64, scratch_operands = 0 : i64, tpu.core_type = #tpu.core_type<tc>} {
    %c0 = arith.constant 0 : index
    %c0_0 = arith.constant 0 : index
    %0 = vector.load %arg0[%c0, %c0_0] : memref<2x32xf32, #tpu.memory_space<vmem>>, vector<2x32xf32>
    %c0_1 = arith.constant 0 : index
    %c0_2 = arith.constant 0 : index
    %1 = vector.load %arg1[%c0_1, %c0_2] : memref<32x32xf32, #tpu.memory_space<vmem>>, vector<32x32xf32>
    %cst = arith.constant dense<0.000000e+00> : vector<2x32xf32>
    %2 = tpu.matmul %0, %1, %cst {dimension_numbers = #tpu.dot_dimension_numbers<[1], [0], [0], [1], [0, 0, 1, 1], [], []>} : vector<2x32xf32>, vector<32x32xf32>, vector<2x32xf32> -> vector<2x32xf32>
    %c0_3 = arith.constant 0 : index
    %c0_4 = arith.constant 0 : index
    %3 = vector.load %arg2[%c0_3, %c0_4] : memref<1x32xf32, #tpu.memory_space<vmem>>, vector<1x32xf32>
    %4 = vector.broadcast %3 : vector<1x32xf32> to vector<2x32xf32>
    %5 = arith.addf %2, %4 : vector<2x32xf32>
    %cst_5 = arith.constant 0.000000e+00 : f32
    %6 = vector.broadcast %cst_5 : f32 to vector<2x32xf32>
    %7 = arith.maximumf %5, %6 : vector<2x32xf32>
    %c0_6 = arith.constant 0 : index
    %c0_7 = arith.constant 0 : index
    %8 = vector.load %arg3[%c0_6, %c0_7] : memref<32x32xf32, #tpu.memory_space<vmem>>, vector<32x32xf32>
    %cst_8 = arith.constant dense<0.000000e+00> : vector<2x32xf32>
    %9 = tpu.matmul %7, %8, %cst_8 {dimension_numbers = #tpu.dot_dimension_numbers<[1], [0], [0], [1], [0, 0, 1, 1], [], []>} : vector<2x32xf32>, vector<32x32xf32>, vector<2x32xf32> -> vector<2x32xf32>
    %c0_9 = arith.constant 0 : index
    %c0_10 = arith.constant 0 : index
    %10 = vector.load %arg4[%c0_9, %c0_10] : memref<1x32xf32, #tpu.memory_space<vmem>>, vector<1x32xf32>
    %11 = vector.broadcast %10 : vector<1x32xf32> to vector<2x32xf32>
    %12 = arith.addf %9, %11 : vector<2x32xf32>
    %cst_11 = arith.constant 0.000000e+00 : f32
    %13 = vector.broadcast %cst_11 : f32 to vector<2x32xf32>
    %14 = arith.maximumf %12, %13 : vector<2x32xf32>
    %c0_12 = arith.constant 0 : index
    %c0_13 = arith.constant 0 : index
    %15 = vector.load %arg5[%c0_12, %c0_13] : memref<32x8xf32, #tpu.memory_space<vmem>>, vector<32x8xf32>
    %cst_14 = arith.constant dense<0.000000e+00> : vector<2x8xf32>
    %16 = tpu.matmul %14, %15, %cst_14 {dimension_numbers = #tpu.dot_dimension_numbers<[1], [0], [0], [1], [0, 0, 1, 1], [], []>} : vector<2x32xf32>, vector<32x8xf32>, vector<2x8xf32> -> vector<2x8xf32>
    %c0_15 = arith.constant 0 : index
    %c0_16 = arith.constant 0 : index
    %17 = vector.load %arg6[%c0_15, %c0_16] : memref<1x8xf32, #tpu.memory_space<vmem>>, vector<1x8xf32>
    %18 = vector.broadcast %17 : vector<1x8xf32> to vector<2x8xf32>
    %19 = arith.addf %16, %18 : vector<2x8xf32>
    %c0_17 = arith.constant 0 : index
    %c0_18 = arith.constant 0 : index
    %20 = vector.load %arg7[%c0_17, %c0_18] : memref<2x8xf32, #tpu.memory_space<vmem>>, vector<2x8xf32>
    tpu.vector_store %arg7[%c0_17, %c0_18], %19 {strides = array<i32>} : memref<2x8xf32, #tpu.memory_space<vmem>>, vector<2x8xf32>,
    return
  }
}

</mosaic_0001>

<bundles_post_ra>
// kernel: tpu_custom_call.1
= control target key start
LH: loop header
LB: loop body
LE: loop exit
PB: predicated region body
PF: predicated region fallthrough
CT: control target
= control target key end

     0   :  { %12 = vsyncpa [#allocation3], 0  ;;  %s554_s0 = inlined_call_operand.vmem [shape: f32[2,32], index: 0, kind: input, shape index: {}]   ;;  %s555_s1 = inlined_call_operand.vmem [shape: f32[32,32], index: 1, kind: input, shape index: {}]   ;;  %s556_s2 = inlined_call_operand.vmem [shape: f32[1,32], index: 2, kind: input, shape index: {}]   ;;  %s557_s3 = inlined_call_operand.hbm [shape: f32[32,32], index: 3, kind: input, shape index: {}]   ;;  %s558_s4 = inlined_call_operand.vmem [shape: f32[1,32], index: 4, kind: input, shape index: {}]   ;;  %s559_s5 = inlined_call_operand.vmem [shape: f32[32,8], index: 5, kind: input, shape index: {}]   ;;  %s560_s6 = inlined_call_operand.vmem [shape: f32[1,8], index: 6, kind: input, shape index: {}]   ;;  %s561_s7 = inlined_call_operand.hbm [shape: f32[2,8], index: 7, kind: output, shape index: {}]  }
   0x1   :  { %13 = vsyncpa [#allocation4], 0  ;;  %s441_s24 = smov [#allocation2]   ;;  %s393_s28 = scalar_lea.hbm %s557_s3, 512 }
   0x2   :  { %s25_s25 = sshll.u32 %s441_s24, 4  ;;  %p394_p0 = scmp.ne.s32.totalorder %s557_s3, %s393_s28  ;;  %s26_s25 = int_to_ptr.vmem [resolvable:$true] %s25_s25 }
   0x3   :  { %p397_p1 = scmp.lt.u32.totalorder %s393_s28, %s557_s3 }
   0x5   :  { %p399_p2 = pnand %p397_p1, %p394_p0 }
   0x7   :  { %402 = shalt.err (!%p399_p2)
}
   0x8   :  { %s403_s10 = scalar_lea.vmem %s26_s25, 512  ;;  %p408_p4 = scmp.lt.s32.totalorder %s26_s25, %s26_s25 }
   0x9   :  { %p404_p3 = scmp.ne.s32.totalorder %s26_s25, %s403_s10  ;;  %p409_p5 = scmp.lt.s32.totalorder %s403_s10, %s403_s10 }
   0xb   :  { %p410_p6 = por %p409_p5, %p408_p4 }
   0xd   :  { %p411_p7 = pnand %p410_p6, %p404_p3 }
   0xf   :  { %414 = shalt.err (!%p411_p7)
}
  0x10   :  { %s442_s11 = smov 128   ;;  %s443_s12 = smov 8  }
  0x11   :  { %31 = dma.hbm_to_vmem [thread:$0]  %s557_s3, 512, %s26_s25, [#allocation3], %s442_s11, %s442_s11, %s443_s12  }
  0x12   :  { %437 = dma.done.wait [#allocation3], 512  }
  0x13   :  { %438 = vsyncadd [#allocation3], 4294966784  ;;  %v444_v0 = vmov 0.0|0.0   ;;  %vm445_vm0 = vmmov 0   ;;  %v446_v1 = vmov 0.0   ;;  %v42_v2 = vld [vmem:[%s555_s1] sm:$0xff] }
  0x14   :  { %368 = vmatprep.subr.bf16.mxu0 %v444_v0  ;;  %343 = vmatprep.mubr.msk.f32.mxu0 %vm445_vm0, %v446_v1  ;;  %v43_v3 = vld [vmem:[%s555_s1 + $0x8] sm:$0xff]  ;;  %v44_v4 = vld [vmem:[%s555_s1 + $0x10] sm:$0xff]  ;;  %v45_v6 = vld [vmem:[%s555_s1 + $0x18] sm:$0xff]  ;;  %vm53_vm1 = vcmask 261120   ;;  %s447_s12 = smov [#allocation5]   ;;  %vm297_vm2 = vcmask 58368  }
  0x15   :  { %374 = vmatprep.subr.bf16.mxu1 %v444_v0  ;;  %354 = vmatprep.mubr.msk.f32.mxu1 %vm445_vm0, %v446_v1  ;;  %v369_v5 = vpack.c.bf16 %v43_v3, %v42_v2  ;;  %v128_v7 = vld [vmem:[#allocation2] sm:$0xff]  ;;  %v129_v8 = vld [vmem:[#allocation2 + $0x8] sm:$0xff]  ;;  %v372_v9 = vpack.c.bf16 %v45_v6, %v44_v4  ;;  %v130_v12 = vld [vmem:[#allocation2 + $0x10] sm:$0xff]  ;;  %s305_s13 = sshll.u32 %s447_s12, 4  ;;  %s306_s13 = int_to_ptr.vmem [resolvable:$true] %s305_s13 }
  0x16   :  { %v375_v10 = vpack.c.bf16 %v129_v8, %v128_v7  ;;  %v41_v11 = vld [vmem:[%s554_s0] sm:$0x3]  ;;  %v131_v13 = vld [vmem:[#allocation2 + $0x18] sm:$0xff]  ;;  %v214_v16 = vld [vmem:[%s559_s5 + $0x8] sm:$0xff]  ;;  %p420_p9 = scmp.lt.s32.totalorder %s306_s13, %s306_s13 }
  0x17   :  { %370 = vmatpush3.bf16.msra.mxu0 %v369_v5  ;;  %v378_v14 = vpack.c.bf16 %v131_v13, %v130_v12  ;;  %v213_v15 = vld [vmem:[%s559_s5] sm:$0xff]  ;;  %v215_v23 = vld [vmem:[%s559_s5 + $0x10] sm:$0xff]  ;;  %v216_v24 = vld [vmem:[%s559_s5 + $0x18] sm:$0xff]  ;;  %s415_s5 = scalar_lea.vmem %s306_s13, 32 }
  0x18   :  { %371 = vmatprep.subr.bf16.mxu0 %v444_v0  ;;  %376 = vmatpush3.bf16.msra.mxu1 %v375_v10  ;;  %v381_v17 = vpack.c.bf16 %v214_v16, %v213_v15  ;;  %v314_v18 = vld [vmem:[%s556_s2] ss:$0 sm:$0xff]  ;;  %v384_v25 = vpack.c.bf16 %v216_v24, %v215_v23  ;;  %p416_p8 = scmp.ne.s32.totalorder %s306_s13, %s415_s5  ;;  %p421_p10 = scmp.lt.s32.totalorder %s415_s5, %s415_s5 }
  0x19   :  { %377 = vmatprep.subr.bf16.mxu1 %v444_v0  ;;  %v316_v26 = vld [vmem:[%s558_s4] ss:$0 sm:$0xff] }
  0x1a   :  { %v318_v31 = vld [vmem:[%s560_s6] ss:$0 sm:$0xff]  ;;  %p422_p11 = por %p421_p10, %p420_p9 }
  0x1b   :  { %373 = vmatpush3.bf16.msra.mxu0 %v372_v9 }
  0x1c   :  { %380 = vmatprep.subr.bf16.mxu0 %v444_v0  ;;  %379 = vmatpush3.bf16.msra.mxu1 %v378_v14  ;;  %p423_p12 = pnand %p422_p11, %p416_p8 }
  0x1e   :  { %344 = vmatmul.mubr.msk.f32.vlgmr.msra.gmra.mrb[0].mxu0 %vm53_vm1, %v41_v11 }
  0x1f   :  { %365 = vmatprep.mubr.msk.f32.mxu0 %vm445_vm0, %v446_v1  ;;  %382 = vmatpush3.bf16.msra.mxu0 %v381_v17 }
  0x20   :  { %383 = vmatprep.subr.bf16.mxu0 %v444_v0 }
  0x23   :  { %385 = vmatpush3.bf16.msra.mxu0 %v384_v25 }
  0xf1   :  { %v123_v19 = vpop.f32.mrb[0].mxu0 }
  0xf2   :  { %v124_v20 = vadd.f32 %v314_v18, %v123_v19  ;;  %v345_v21 = vpop.f32.mrb[1].mxu0 }
  0xf4   :  { %v127_v22 = vmax.f32 %v124_v20, 0.0 }
  0xf6   :  { %355 = vmatmul.mubr.msk.f32.vlgmr.msra.gmra.mrb[0].mxu1 %vm53_vm1, %v127_v22 }
 0x1c9   :  { %v208_v27 = vpop.f32.mrb[0].mxu1 }
 0x1ca   :  { %v209_v28 = vadd.f32 %v316_v26, %v208_v27  ;;  %v356_v29 = vpop.f32.mrb[1].mxu1 }
 0x1cc   :  { %v212_v30 = vmax.f32 %v209_v28, 0.0 }
 0x1ce   :  { %366 = vmatmul.mubr.msk.f32.vlgmr.msra.gmra.mrb[2].mxu0 %vm53_vm1, %v212_v30 }
 0x2a1   :  { %v293_v32 = vpop.f32.mrb[2].mxu0 }
 0x2a2   :  { %v294_v33 = vadd.f32 %v318_v31, %v293_v32  ;;  %v367_v34 = vpop.f32.mrb[3].mxu0 }
 0x2a4   :  { %298 = vst.msk [vmem:[#allocation5] sm:$0x3] %vm297_vm2, %v294_v33 }
 0x2a5   :  { %426 = shalt.err (!%p423_p12)
}
 0x2a6   :  { %s427_s15 = scalar_lea.hbm %s561_s7, 32 }
 0x2a7   :  { %p428_p13 = scmp.ne.s32.totalorder %s561_s7, %s427_s15  ;;  %p431_p0 = scmp.lt.u32.totalorder %s427_s15, %s561_s7 }
 0x2a9   :  { %p433_p1 = pnand %p431_p0, %p428_p13 }
 0x2ab   :  { %436 = shalt.err (!%p433_p1)
}
 0x2ac   :  { %308 = dma.vmem_to_hbm [thread:$0]  %s306_s13, 32, %s561_s7, [#allocation4]  }
 0x2ad   :  { %439 = dma.done.wait [#allocation4], 32  }
 0x2ae   :  { %440 = vsyncadd [#allocation4], 4294967264 }
 0x2af   :  { %312 = vsyncpa [#allocation3], 1 }
 0x2b0   :  { %313 = vsyncpa [#allocation4], 1 }

</bundles_post_ra>
